<compile_context>
chip_gen: v7x
topology: tpu7x:2x2x1
jax: 0.10.0
libtpu: 0.0.40
codegen_flags: <defaults>
</compile_context>

<pallas_src>
import jax
import jax.numpy as jnp
from jax.experimental import pallas as pl
from jax.experimental.pallas import tpu as pltpu


def state_enc_kernel(x_ref, w_ref, b_ref, out_ref):
    # In-kernel bf16 cast of x (free VPU filler under the DMA); f32 accumulation
    # on the MXU; softmax entirely in f32.
    x = x_ref[...].astype(jnp.bfloat16)                       # [TB, IN]
    logits = jax.lax.dot_general(
        x, w_ref[...], (((1,), (0,)), ((), ())),
        preferred_element_type=jnp.float32,
    ) + b_ref[...]                                            # [TB, OUT_PAD]

    # Numerically stable softmax.  Padded lanes carry bias -1e30 and zero weight
    # columns, so they contribute ~0 to the max/denominator.
    m = jnp.max(logits, axis=-1, keepdims=True)
    e = jnp.exp(logits - m)
    s = jnp.sum(e, axis=-1, keepdims=True)
    out_ref[...] = e * pl.reciprocal(s, approx=True)


def prepare_effective_params(params, num_hidden):
    """Collapse the activation-free Linear stack once, in f32, and pad lane-dense.

    Returns (W_eff[bf16, IN x OUT_PAD], b_eff[f32, 1 x OUT_PAD], output_size).
    Call once and reuse across forward calls (avoids per-call weight casts).
    """
    w1, b1, wh, bh, wo, bo = params
    W = w1                      # [IN, H]
    b = b1                      # [1, H]
    for i in range(num_hidden):
        W = W @ wh[i]
        b = b @ wh[i] + bh[i]
    W_eff = W @ wo              # [IN, OUT]
    b_eff = b @ wo + bo         # [1, OUT]

    output_size = W_eff.shape[1]
    out_pad = max(128, pl.cdiv(output_size, 128) * 128)       # lane-dense output
    pad = out_pad - output_size
    if pad:
        W_eff = jnp.pad(W_eff, ((0, 0), (0, pad)))             # zero weight cols
        b_eff = jnp.pad(b_eff, ((0, 0), (0, pad)), constant_values=-1e30)
    return W_eff.astype(jnp.bfloat16), b_eff.astype(jnp.float32), output_size


def state_enc_forward(x, w_eff, b_eff, output_size, tile_b=512):
    """Pallas forward pass for StateEncNet (seq_size == 1 path)."""
    batch, input_size = x.shape
    out_pad = w_eff.shape[1]

    # Batch tiling: 8-aligned tiles; grid handles the ragged last tile (masked
    # boundary stores), so no wrapper-side padding of x.
    if batch <= tile_b:
        if batch >= 16:
            # >= 2 grid steps so ("parallel",) shards across both TCs on v7x.
            tb = ((pl.cdiv(batch, 2) + 7) // 8) * 8
        else:
            tb = batch          # single full-array block (== full dim, no (8,128) issue)
    else:
        tb = tile_b
    grid = (pl.cdiv(batch, tb),)

    const2 = lambda i: (0, 0)
    out = pl.pallas_call(
        state_enc_kernel,
        out_shape=jax.ShapeDtypeStruct((batch, out_pad), jnp.float32),
        grid=grid,
        in_specs=[
            pl.BlockSpec((tb, input_size), lambda i: (i, 0)),
            pl.BlockSpec((input_size, out_pad), const2),       # VMEM-resident, tiny
            pl.BlockSpec((1, out_pad), const2),
        ],
        out_specs=pl.BlockSpec((tb, out_pad), lambda i: (i, 0)),
        compiler_params=pltpu.CompilerParams(
            dimension_semantics=("parallel",),
            vmem_limit_bytes=32 * 1024 * 1024,                 # > v5e's 16 MiB default
        ),
    )(x, w_eff, b_eff)

    return out[:, :output_size]


def init_params(key, input_size, output_size, hidden_dim, num_hidden):
    """PyTorch-like init U(-1/sqrt(fan_in), 1/sqrt(fan_in)), stored lane-major [in, out]."""
    ks = jax.random.split(key, 6)

    def lin(k, fan_in, shape):
        bound = 1.0 / float(fan_in) ** 0.5
        return jax.random.uniform(k, shape, jnp.float32, -bound, bound)

    w1 = lin(ks[0], input_size, (input_size, hidden_dim))
    b1 = lin(ks[1], input_size, (1, hidden_dim))
    wh = lin(ks[2], hidden_dim, (num_hidden, hidden_dim, hidden_dim))
    bh = lin(ks[3], hidden_dim, (num_hidden, 1, hidden_dim))
    wo = lin(ks[4], hidden_dim, (hidden_dim, output_size))
    bo = lin(ks[5], hidden_dim, (1, output_size))
    return (w1, b1, wh, bh, wo, bo)


def reference_forward(x, params, num_hidden):
    """Pure-JAX f32 reference mirroring the PyTorch forward (layer by layer)."""
    w1, b1, wh, bh, wo, bo = params
    h = x @ w1 + b1
    for i in range(num_hidden):
        h = h @ wh[i] + bh[i]
    logits = h @ wo + bo
    return jax.nn.softmax(logits, axis=-1)


if __name__ == "__main__":
    batch = 2
    input_size = 16
    hidden_dim = 32
    output_size = 8
    num_hidden = 1

    key = jax.random.PRNGKey(0)
    kx, kp = jax.random.split(key)
    x = jax.random.normal(kx, (batch, input_size), dtype=jnp.float32)
    params = init_params(kp, input_size, output_size, hidden_dim, num_hidden)

    # Collapse + cast + lane-pad once (re-used across forward calls).
    w_eff, b_eff, out_size = prepare_effective_params(params, num_hidden)

    out = state_enc_forward(x, w_eff, b_eff, out_size)
    out = jax.block_until_ready(out)

    ref = reference_forward(x, params, num_hidden)
    assert out.shape == (batch, output_size)
    # bf16 matmul operand + approx reciprocal -> relaxed tolerance vs f32 reference.
    assert jnp.allclose(out, ref, atol=1e-2, rtol=1e-2), "Pallas kernel mismatch vs reference"
    assert jnp.allclose(jnp.sum(out, axis=-1), 1.0, atol=1e-2), "softmax rows must sum to ~1"

    print("KERNEL_OK")
</pallas_src>

<mosaic_0001>
module attributes {stable_mosaic.version = 11 : i64} {
  func.func @state_enc_kernel(%arg0: i32, %arg1: memref<2x16xf32, #tpu.memory_space<vmem>>, %arg2: memref<16x128xbf16, #tpu.memory_space<vmem>>, %arg3: memref<1x128xf32, #tpu.memory_space<vmem>>, %arg4: memref<2x128xf32, #tpu.memory_space<vmem>>) attributes {dimension_semantics = [#tpu.dimension_semantics<parallel>], iteration_bounds = array<i64: 1>, scalar_prefetch = 0 : i64, scratch_operands = 0 : i64, tpu.core_type = #tpu.core_type<tc>, window_params = [{transform_indices = @transform_0, window_bounds = array<i64: 2, 16>}, {pipeline_mode = #tpu.pipeline_mode<synchronous>, transform_indices = @transform_1, window_bounds = array<i64: 16, 128>}, {pipeline_mode = #tpu.pipeline_mode<synchronous>, transform_indices = @transform_2, window_bounds = array<i64: 1, 128>}, {transform_indices = @transform_3, window_bounds = array<i64: 2, 128>}]} {
    %c0 = arith.constant 0 : index
    %c0_0 = arith.constant 0 : index
    %0 = vector.load %arg1[%c0, %c0_0] : memref<2x16xf32, #tpu.memory_space<vmem>>, vector<2x16xf32>
    %1 = arith.truncf %0 : vector<2x16xf32> to vector<2x16xbf16>
    %c0_1 = arith.constant 0 : index
    %c0_2 = arith.constant 0 : index
    %2 = vector.load %arg2[%c0_1, %c0_2] : memref<16x128xbf16, #tpu.memory_space<vmem>>, vector<16x128xbf16>
    %cst = arith.constant dense<0.000000e+00> : vector<2x128xf32>
    %3 = tpu.matmul %1, %2, %cst {dimension_numbers = #tpu.dot_dimension_numbers<[1], [0], [0], [1], [0, 0, 1, 1], [], []>} : vector<2x16xbf16>, vector<16x128xbf16>, vector<2x128xf32> -> vector<2x128xf32>
    %c0_3 = arith.constant 0 : index
    %c0_4 = arith.constant 0 : index
    %4 = vector.load %arg3[%c0_3, %c0_4] : memref<1x128xf32, #tpu.memory_space<vmem>>, vector<1x128xf32>
    %5 = vector.broadcast %4 : vector<1x128xf32> to vector<2x128xf32>
    %6 = arith.addf %3, %5 : vector<2x128xf32>
    %cst_5 = arith.constant dense<0xFF800000> : vector<2xf32>
    %7 = vector.multi_reduction <maximumf>, %6, %cst_5 [1] : vector<2x128xf32> to vector<2xf32>
    %8 = vector.shape_cast %7 : vector<2xf32> to vector<2x1xf32>
    %9 = vector.broadcast %8 : vector<2x1xf32> to vector<2x128xf32>
    %10 = arith.subf %6, %9 : vector<2x128xf32>
    %11 = math.exp %10 : vector<2x128xf32>
    %cst_6 = arith.constant dense<0.000000e+00> : vector<2xf32>
    %12 = vector.multi_reduction <add>, %11, %cst_6 [1] : vector<2x128xf32> to vector<2xf32>
    %13 = vector.shape_cast %12 : vector<2xf32> to vector<2x1xf32>
    %14 = tpu.reciprocal %13 {approx = true} : vector<2x1xf32> -> vector<2x1xf32>
    %15 = vector.broadcast %14 : vector<2x1xf32> to vector<2x128xf32>
    %16 = arith.mulf %11, %15 : vector<2x128xf32>
    %c0_7 = arith.constant 0 : index
    %c0_8 = arith.constant 0 : index
    %17 = vector.load %arg4[%c0_7, %c0_8] : memref<2x128xf32, #tpu.memory_space<vmem>>, vector<2x128xf32>
    tpu.vector_store %arg4[%c0_7, %c0_8], %16 {strides = array<i32>} : memref<2x128xf32, #tpu.memory_space<vmem>>, vector<2x128xf32>,
    return
  }
  func.func @transform_0(%arg0: i32) -> (i32, i32) {
    %c0_i32 = arith.constant 0 : i32
    %c0_i32_0 = arith.constant 0 : i32
    return %arg0, %c0_i32 : i32, i32
  }
  func.func @transform_1(%arg0: i32) -> (i32, i32) {
    %c0_i32 = arith.constant 0 : i32
    %c0_i32_0 = arith.constant 0 : i32
    %c0_i32_1 = arith.constant 0 : i32
    return %c0_i32, %c0_i32_0 : i32, i32
  }
  func.func @transform_2(%arg0: i32) -> (i32, i32) {
    %c0_i32 = arith.constant 0 : i32
    %c0_i32_0 = arith.constant 0 : i32
    %c0_i32_1 = arith.constant 0 : i32
    return %c0_i32, %c0_i32_0 : i32, i32
  }
  func.func @transform_3(%arg0: i32) -> (i32, i32) {
    %c0_i32 = arith.constant 0 : i32
    %c0_i32_0 = arith.constant 0 : i32
    return %arg0, %c0_i32 : i32, i32
  }
}

</mosaic_0001>

<bundles_post_ra>
// kernel: tpu_custom_call.1
= control target key start
LH: loop header
LB: loop body
LE: loop exit
PB: predicated region body
PF: predicated region fallthrough
CT: control target
= control target key end

     0   :  { %8 = vsyncpa [#allocation3], 0  ;;  %s300_s0 = inlined_call_operand.hbm [shape: f32[2,16], index: 0, kind: input, shape index: {}]   ;;  %s301_s1 = inlined_call_operand.hbm [shape: bf16[16,128], index: 1, kind: input, shape index: {}]   ;;  %s302_s2 = inlined_call_operand.vmem [shape: f32[1,128], index: 2, kind: input, shape index: {}]   ;;  %s303_s3 = inlined_call_operand.hbm [shape: f32[2,128], index: 3, kind: output, shape index: {}]  }
   0x1   :  { %9 = vsyncpa [#allocation6], 0 }
   0x2   :  { %10 = vsyncpa [#allocation4], 0  ;;  %s227_s12 = smov [#allocation2]   ;;  %s228_s14 = smov [#allocation5]  }
   0x3   :  { %s17_s13 = sshll.u32 %s227_s12, 4  ;;  %s26_s15 = sshll.u32 %s228_s14, 4  ;;  %s18_s13 = int_to_ptr.vmem [resolvable:$true] %s17_s13  ;;  %s254_s15 = int_to_ptr.vmem [resolvable:$true] %s26_s15 }
   0x4   :  { %s155_s18 = scalar_lea.hbm %s300_s0, 32 }
   0x5   :  { %p156_p0 = scmp.ne.s32.totalorder %s300_s0, %s155_s18  ;;  %p159_p1 = scmp.lt.u32.totalorder %s155_s18, %s300_s0 }
   0x7   :  { %p161_p2 = pnand %p159_p1, %p156_p0 }
   0x9   :  { %164 = shalt.err (!%p161_p2)
}
   0xa   :  { %s165_s23 = scalar_lea.vmem %s18_s13, 32  ;;  %p170_p4 = scmp.lt.s32.totalorder %s18_s13, %s18_s13 }
   0xb   :  { %p166_p3 = scmp.ne.s32.totalorder %s18_s13, %s165_s23  ;;  %p171_p5 = scmp.lt.s32.totalorder %s165_s23, %s165_s23 }
   0xd   :  { %p172_p6 = por %p171_p5, %p170_p4 }
   0xf   :  { %p173_p7 = pnand %p172_p6, %p166_p3 }
  0x11   :  { %176 = shalt.err (!%p173_p7)
}
  0x12   :  { %20 = dma.hbm_to_vmem [thread:$0]  %s300_s0, 32, %s18_s13, [#allocation3]  }
  0x13   :  { %s177_s28 = scalar_lea.hbm %s301_s1, 128 }
  0x14   :  { %p178_p8 = scmp.ne.s32.totalorder %s301_s1, %s177_s28  ;;  %p181_p9 = scmp.lt.u32.totalorder %s177_s28, %s301_s1 }
  0x16   :  { %p183_p10 = pnand %p181_p9, %p178_p8 }
  0x18   :  { %186 = shalt.err (!%p183_p10)
}
  0x19   :  { %s187_s6 = scalar_lea.vmem %s254_s15, 128  ;;  %p192_p12 = scmp.lt.s32.totalorder %s254_s15, %s254_s15 }
  0x1a   :  { %p188_p11 = scmp.ne.s32.totalorder %s254_s15, %s187_s6  ;;  %p193_p13 = scmp.lt.s32.totalorder %s187_s6, %s187_s6 }
  0x1c   :  { %p194_p0 = por %p193_p13, %p192_p12 }
  0x1e   :  { %p195_p1 = pnand %p194_p0, %p188_p11 }
  0x20   :  { %198 = shalt.err (!%p195_p1)
}
  0x21   :  { %s229_s0 = smov 64   ;;  %s230_s7 = smov 4  }
  0x22   :  { %32 = dma.hbm_to_vmem [thread:$0]  %s301_s1, 128, %s254_s15, [#allocation6], %s229_s0, %s229_s0, %s230_s7  }
  0x23   :  { %221 = dma.done.wait [#allocation3], 32  }
  0x24   :  { %222 = vsyncadd [#allocation3], 4294967264 }
  0x25   :  { %223 = dma.done.wait [#allocation6], 128  }
  0x26   :  { %224 = vsyncadd [#allocation6], 4294967168  ;;  %v231_v0 = vmov 0.0   ;;  %vm232_vm0 = vmmov 0   ;;  %v150_v1 = vld [vmem:[#allocation5] sm:$0xff]   ;;  %vm59_vm1 = vcmask 130048  }
  0x27   :  { %137 = vmatprep.subr.bf16.mxu0 %v231_v0  ;;  %139 = vmatprep.mubr.msk.bf16.mxu0 %vm232_vm0, %v231_v0  ;;  %v42_v2 = vld [vmem:[#allocation2] sm:$0x3]  ;;  %vm103_vm2 = vcmask 1041408   ;;  %s233_s1 = smov [#allocation7]  }
  0x28   :  { %138 = vmatpush3.bf16.msra.mxu0 %v150_v1  ;;  %v43_v3 = vpack.c.bf16 %v42_v2, %v42_v2  ;;  %v132_v4 = vld [vmem:[%s302_s2] ss:$0 sm:$0xff]  ;;  %s122_s12 = sshll.u32 %s233_s1, 4  ;;  %s123_s12 = int_to_ptr.vmem [resolvable:$true] %s122_s12 }
  0x29   :  { %s199_s2 = scalar_lea.vmem %s123_s12, 32  ;;  %p204_p3 = scmp.lt.s32.totalorder %s123_s12, %s123_s12 }
  0x2a   :  { %p200_p2 = scmp.ne.s32.totalorder %s123_s12, %s199_s2  ;;  %p205_p4 = scmp.lt.s32.totalorder %s199_s2, %s199_s2 }
  0x2b   :  { %140 = vmatmul.mubr.msk.bf16.vlgmr.msra.gmra.mrb[0].mxu0 %vm59_vm1, %v43_v3 }
  0x2c   :  { %p206_p5 = por %p205_p4, %p204_p3 }
  0x2e   :  { %p207_p6 = pnand %p206_p5, %p200_p2 }
  0xfe   :  { %v97_v5 = vpop.f32.mrb[0].mxu0 }
  0xff   :  { %v98_v6 = vadd.f32 %v132_v4, %v97_v5  ;;  %v141_v7 = vpop.f32.mrb[1].mxu0 }
 0x100   :  { %v100_v8 = vpop.f32.mrb[2].mxu0 }
 0x101   :  { %v142_v9 = vpop.f32.mrb[3].mxu0  ;;  %v104_v10 = vsel %vm103_vm2, %v98_v6, -inf }
 0x102   :  { %105 = vmax.xlane.f32.xlu0 %v104_v10 }
 0x18f   :  { %v106_v11 = vpop.xlane.xlu0 %105 }
 0x190   :  { %v107_v12 = vsub.f32 %v98_v6, %v106_v11 }
 0x192   :  { %v108_v13 = vmul.f32 1.442695, %v107_v12 }
 0x194   :  { %151 = vpow2.f32 %v108_v13 }
 0x19e   :  { %v152_v14 = vpop.eup %151 }
 0x19f   :  { %v110_v15 = vsel %vm103_vm2, %v152_v14, 0.0 }
 0x1a0   :  { %111 = vadd.xlane.f32.xlu0 %v110_v15 }
 0x22d   :  { %v112_v16 = vpop.xlane.xlu0 %111 }
 0x22e   :  { %153 = vrcp.f32 %v112_v16 }
 0x238   :  { %v154_v17 = vpop.eup %153 }
 0x239   :  { %v114_v18 = vmul.f32 %v154_v17, %v152_v14 }
 0x23b   :  { %115 = vst [vmem:[#allocation7] sm:$0x3] %v114_v18 }
 0x23c   :  { %210 = shalt.err (!%p207_p6)
}
 0x23d   :  { %s211_s15 = scalar_lea.hbm %s303_s3, 32 }
 0x23e   :  { %p212_p7 = scmp.ne.s32.totalorder %s303_s3, %s211_s15  ;;  %p215_p8 = scmp.lt.u32.totalorder %s211_s15, %s303_s3 }
 0x240   :  { %p217_p9 = pnand %p215_p8, %p212_p7 }
 0x242   :  { %220 = shalt.err (!%p217_p9)
}
 0x243   :  { %125 = dma.vmem_to_hbm [thread:$0]  %s123_s12, 32, %s303_s3, [#allocation4]  }
 0x244   :  { %225 = dma.done.wait [#allocation4], 32  }
 0x245   :  { %226 = vsyncadd [#allocation4], 4294967264 }
 0x246   :  { %129 = vsyncpa [#allocation3], 1 }
 0x247   :  { %130 = vsyncpa [#allocation6], 1 }
 0x248   :  { %131 = vsyncpa [#allocation4], 1 }

</bundles_post_ra>
